<compile_context>
chip_gen: v7x
topology: tpu7x:2x2x1
jax: 0.10.0
libtpu: 0.0.40
codegen_flags: <defaults>
</compile_context>

<pallas_src>
import jax
import jax.numpy as jnp
from jax.experimental import pallas as pl
from jax.experimental.pallas import tpu as pltpu


def _make_kernel(groups: int, go: int, gi: int):
    """go = in_features // groups, gi = hidden_dim // groups."""

    def kernel(gate_ref,          # SMEM (2,)  f32: [scale*w0, scale*w1]
               aw_ref,            # VMEM (H, F)   conv_A weight
               bw_ref,            # VMEM (F, GI)  conv_B weight
               dw_ref,            # VMEM (F, GI)  conv_D weight
               bwT_ref,           # VMEM (GI, F)  conv_B weight, transposed
               dwT_ref,           # VMEM (GI, F)  conv_D weight, transposed
               abexp_ref,         # VMEM (GI, F)  conv_A bias expanded per group layout
               bb_ref,            # VMEM (1, F)   conv_B bias
               db_ref,            # VMEM (1, F)   conv_D bias
               repm_ref,          # out  (F, F)
               repb_ref):         # out  (1, F)   lane-dense bias
        F = repm_ref.shape[0]
        sw0 = gate_ref[0]                      # scalar: scale * weights[0, 0]
        sw1 = gate_ref[1]                      # scalar: scale * weights[0, 1]

        # ---- rep_matrix = block_diag(B*s*w0 + D*s*w1) @ A_w + I, per group ----
        # Unrolled per-group matmul: contraction length is GI = H/groups instead
        # of H, and no (F, H) block-diagonal is ever materialized.
        for g in range(groups):
            r0 = g * go
            scaled_blk = (bw_ref[r0:r0 + go, :] * sw0 +
                          dw_ref[r0:r0 + go, :] * sw1)              # (GO, GI)
            aw_blk = aw_ref[g * gi:(g + 1) * gi, :]                 # (GI, F)
            blk = jnp.dot(scaled_blk, aw_blk,
                          preferred_element_type=jnp.float32)       # (GO, F)
            # identity contribution for this row block only
            row = jax.lax.broadcasted_iota(jnp.int32, (go, F), 0) + r0
            col = jax.lax.broadcasted_iota(jnp.int32, (go, F), 1)
            repm_ref[r0:r0 + go, :] = blk + jnp.where(row == col, 1.0, 0.0)

        # ---- rep_bias = matrix_2 @ A_b + (B_b*s*w0 + D_b*s*w1), lane-dense ----
        # VPU multiply + sublane (XLU) reduce over GI rows; no 1-lane MXU matmul.
        scaled_T = bwT_ref[...] * sw0 + dwT_ref[...] * sw1           # (GI, F)
        bias1 = jnp.sum(scaled_T * abexp_ref[...], axis=0, keepdims=True)  # (1, F)
        repb_ref[...] = bias1 + bb_ref[...] * sw0 + db_ref[...] * sw1

    return kernel


def pia_adapter_ffn_rep(x, params, *, groups=2, scale=1.0, t=10.0):
    """Returns (rep_matrix (F, F), rep_bias (F,)) — what forward() stashes on self."""
    A_w = params["A_w"].astype(jnp.float32)                 # (H, F)
    H, F = A_w.shape
    assert H % groups == 0, "hidden_dim must be divisible by groups"
    assert F % groups == 0, "in_features must be divisible by groups"
    GI, GO = H // groups, F // groups

    # ---- gating (plain JAX): only batch 0 of x is consumed by the module ----
    xm0 = jnp.mean(x[0].astype(jnp.float32), axis=0)                        # (F,)
    logits = (xm0 @ params["We"].astype(jnp.float32)
              + params["be"].astype(jnp.float32)) / jnp.float32(t)          # (2,)
    w = jax.nn.softmax(logits)
    gate = (jnp.float32(scale) * w).astype(jnp.float32)                     # (2,)

    # ---- tiny layout plumbing for the lane-dense bias path (few KiB) ----
    B_w = params["B_w"].astype(jnp.float32)                 # (F, GI)
    D_w = params["D_w"].astype(jnp.float32)                 # (F, GI)
    BwT, DwT = B_w.T, D_w.T                                 # (GI, F)
    A_b = params["A_b"].astype(jnp.float32).reshape(H)      # (H,)
    # abexp[j, o] = A_b[(o // GO) * GI + j]
    abexp = jnp.repeat(A_b.reshape(groups, GI).T, GO, axis=1)               # (GI, F)
    bb = params["B_b"].astype(jnp.float32).reshape(1, F)
    db = params["D_b"].astype(jnp.float32).reshape(1, F)

    vmem = pl.BlockSpec(memory_space=pltpu.MemorySpace.VMEM)
    smem = pl.BlockSpec(memory_space=pltpu.MemorySpace.SMEM)
    # rep_matrix dominates the footprint; raise scoped VMEM for larger F
    # (v5e default is 16 MiB). For F >= ~2048, tile the output instead.
    vmem_limit = int(max(16 * 2**20, min(64 * 2**20, 8 * F * F)))

    repm, repb = pl.pallas_call(
        _make_kernel(groups, GO, GI),
        out_shape=(jax.ShapeDtypeStruct((F, F), jnp.float32),
                   jax.ShapeDtypeStruct((1, F), jnp.float32)),
        in_specs=[smem] + [vmem] * 8,
        out_specs=(vmem, vmem),
        compiler_params=pltpu.CompilerParams(vmem_limit_bytes=vmem_limit),
    )(gate, A_w, B_w, D_w, BwT, DwT, abexp, bb, db)

    return repm, repb[0]


# ----------------------------- test harness -----------------------------

def _xavier_uniform(key, shape, fan_in, fan_out):
    bound = (6.0 / (fan_in + fan_out)) ** 0.5
    return jax.random.uniform(key, shape, jnp.float32, -bound, bound)


def init_params(key, in_features, hidden_dim, groups):
    gi = hidden_dim // groups
    k = jax.random.split(key, 8)
    # conv_A: (H, F, 1) -> (H, F); conv_B / conv_D: (F, H//groups, 1) -> (F, H//groups)
    A_w = _xavier_uniform(k[0], (hidden_dim, in_features), in_features, hidden_dim)
    B_w = _xavier_uniform(k[1], (in_features, gi), gi, in_features // groups)
    D_w = _xavier_uniform(k[2], (in_features, gi), gi, in_features // groups)
    # The PyTorch module zero-inits conv biases; use small random values here so
    # the bias path of the kernel is actually exercised by the check.
    A_b = 0.1 * jax.random.normal(k[3], (hidden_dim,), jnp.float32)
    B_b = 0.1 * jax.random.normal(k[4], (in_features,), jnp.float32)
    D_b = 0.1 * jax.random.normal(k[5], (in_features,), jnp.float32)
    # expert_weights Linear(F -> 2): transposed weight (F, 2) and bias (2,)
    We = _xavier_uniform(k[6], (in_features, 2), in_features, 2)
    be = jax.random.uniform(k[7], (2,), jnp.float32, -0.1, 0.1)
    return dict(A_w=A_w, A_b=A_b, B_w=B_w, B_b=B_b, D_w=D_w, D_b=D_b, We=We, be=be)


def ref_forward(x, p, groups, scale, t):
    """Pure-JAX reference mirroring the PyTorch code, for correctness check."""
    H, F = p["A_w"].shape
    gi, go = H // groups, F // groups
    xm = x.astype(jnp.float32).mean(axis=1)                       # (B, F)
    w = jax.nn.softmax((xm @ p["We"] + p["be"]) / t, axis=-1)     # (B, 2)
    w0, w1 = w[0, 0], w[0, 1]
    m2 = jnp.zeros((F, H), jnp.float32)
    for i in range(groups):
        blk = (p["B_w"][i * go:(i + 1) * go] * scale * w0 +
               p["D_w"][i * go:(i + 1) * go] * scale * w1)
        m2 = m2.at[i * go:(i + 1) * go, i * gi:(i + 1) * gi].set(blk)
    repm = m2 @ p["A_w"] + jnp.eye(F, dtype=jnp.float32)
    repb = m2 @ p["A_b"] + p["B_b"] * scale * w0 + p["D_b"] * scale * w1
    return repm, repb


if __name__ == "__main__":
    # Small shapes consistent with the module: batch=2, seq=8, in_features=32,
    # hidden_dim=8, groups=2 (group_out=16, group_in=4).
    B, N, F, H, G = 2, 8, 32, 8, 2
    scale, t = 1.0, 10.0

    key = jax.random.PRNGKey(0)
    kx, kp = jax.random.split(key)
    x = jax.random.normal(kx, (B, N, F), jnp.float32)
    params = init_params(kp, F, H, G)

    rep_matrix, rep_bias = pia_adapter_ffn_rep(x, params, groups=G, scale=scale, t=t)
    jax.block_until_ready((rep_matrix, rep_bias))

    # sanity check against pure-JAX reference
    rm_ref, rb_ref = ref_forward(x, params, G, scale, t)
    assert rep_matrix.shape == (F, F) and rep_bias.shape == (F,)
    assert jnp.allclose(rep_matrix, rm_ref, atol=1e-5, rtol=1e-5)
    assert jnp.allclose(rep_bias, rb_ref, atol=1e-5, rtol=1e-5)

    print("KERNEL_OK")
</pallas_src>

<mosaic_0001>
module attributes {stable_mosaic.version = 11 : i64} {
  func.func @kernel(%arg0: memref<2xf32, #tpu.memory_space<smem>>, %arg1: memref<8x32xf32, #tpu.memory_space<vmem>>, %arg2: memref<32x4xf32, #tpu.memory_space<vmem>>, %arg3: memref<32x4xf32, #tpu.memory_space<vmem>>, %arg4: memref<4x32xf32, #tpu.memory_space<vmem>>, %arg5: memref<4x32xf32, #tpu.memory_space<vmem>>, %arg6: memref<4x32xf32, #tpu.memory_space<vmem>>, %arg7: memref<1x32xf32, #tpu.memory_space<vmem>>, %arg8: memref<1x32xf32, #tpu.memory_space<vmem>>, %arg9: memref<32x32xf32, #tpu.memory_space<vmem>>, %arg10: memref<1x32xf32, #tpu.memory_space<vmem>>) attributes {dimension_semantics = [], scalar_prefetch = 0 : i64, scratch_operands = 0 : i64, tpu.core_type = #tpu.core_type<tc>} {
    %c0 = arith.constant 0 : index
    %0 = memref.load %arg0[%c0] : memref<2xf32, #tpu.memory_space<smem>>
    %c1 = arith.constant 1 : index
    %1 = memref.load %arg0[%c1] : memref<2xf32, #tpu.memory_space<smem>>
    %c0_0 = arith.constant 0 : index
    %c0_1 = arith.constant 0 : index
    %2 = vector.load %arg2[%c0_0, %c0_1] : memref<32x4xf32, #tpu.memory_space<vmem>>, vector<16x4xf32>
    %3 = vector.broadcast %0 : f32 to vector<16x4xf32>
    %4 = arith.mulf %2, %3 : vector<16x4xf32>
    %c0_2 = arith.constant 0 : index
    %c0_3 = arith.constant 0 : index
    %5 = vector.load %arg3[%c0_2, %c0_3] : memref<32x4xf32, #tpu.memory_space<vmem>>, vector<16x4xf32>
    %6 = vector.broadcast %1 : f32 to vector<16x4xf32>
    %7 = arith.mulf %5, %6 : vector<16x4xf32>
    %8 = arith.addf %4, %7 : vector<16x4xf32>
    %c0_4 = arith.constant 0 : index
    %c0_5 = arith.constant 0 : index
    %9 = vector.load %arg1[%c0_4, %c0_5] : memref<8x32xf32, #tpu.memory_space<vmem>>, vector<4x32xf32>
    %cst = arith.constant dense<0.000000e+00> : vector<16x32xf32>
    %10 = tpu.matmul %8, %9, %cst {dimension_numbers = #tpu.dot_dimension_numbers<[1], [0], [0], [1], [0, 0, 1, 1], [], []>} : vector<16x4xf32>, vector<4x32xf32>, vector<16x32xf32> -> vector<16x32xf32>
    %11 = tpu.iota {dimensions = array<i32: 0>} : vector<16x32xi32>
    %c0_i32 = arith.constant 0 : i32
    %12 = vector.broadcast %c0_i32 : i32 to vector<16x32xi32>
    %13 = arith.addi %11, %12 : vector<16x32xi32>
    %14 = tpu.iota {dimensions = array<i32: 1>} : vector<16x32xi32>
    %15 = arith.cmpi eq, %13, %14 : vector<16x32xi32>
    %cst_6 = arith.constant 1.000000e+00 : f32
    %cst_7 = arith.constant 0.000000e+00 : f32
    %16 = vector.broadcast %cst_6 : f32 to vector<16x32xf32>
    %17 = vector.broadcast %cst_7 : f32 to vector<16x32xf32>
    %18 = arith.select %15, %16, %17 : vector<16x32xi1>, vector<16x32xf32>
    %19 = arith.addf %10, %18 : vector<16x32xf32>
    %c0_8 = arith.constant 0 : index
    %c0_9 = arith.constant 0 : index
    %20 = vector.load %arg9[%c0_8, %c0_9] : memref<32x32xf32, #tpu.memory_space<vmem>>, vector<16x32xf32>
    tpu.vector_store %arg9[%c0_8, %c0_9], %19 {strides = array<i32>} : memref<32x32xf32, #tpu.memory_space<vmem>>, vector<16x32xf32>,
    %c16 = arith.constant 16 : index
    %c0_10 = arith.constant 0 : index
    %21 = vector.load %arg2[%c16, %c0_10] : memref<32x4xf32, #tpu.memory_space<vmem>>, vector<16x4xf32>
    %22 = vector.broadcast %0 : f32 to vector<16x4xf32>
    %23 = arith.mulf %21, %22 : vector<16x4xf32>
    %c16_11 = arith.constant 16 : index
    %c0_12 = arith.constant 0 : index
    %24 = vector.load %arg3[%c16_11, %c0_12] : memref<32x4xf32, #tpu.memory_space<vmem>>, vector<16x4xf32>
    %25 = vector.broadcast %1 : f32 to vector<16x4xf32>
    %26 = arith.mulf %24, %25 : vector<16x4xf32>
    %27 = arith.addf %23, %26 : vector<16x4xf32>
    %c4 = arith.constant 4 : index
    %c0_13 = arith.constant 0 : index
    %28 = vector.load %arg1[%c4, %c0_13] : memref<8x32xf32, #tpu.memory_space<vmem>>, vector<4x32xf32>
    %cst_14 = arith.constant dense<0.000000e+00> : vector<16x32xf32>
    %29 = tpu.matmul %27, %28, %cst_14 {dimension_numbers = #tpu.dot_dimension_numbers<[1], [0], [0], [1], [0, 0, 1, 1], [], []>} : vector<16x4xf32>, vector<4x32xf32>, vector<16x32xf32> -> vector<16x32xf32>
    %30 = tpu.iota {dimensions = array<i32: 0>} : vector<16x32xi32>
    %c16_i32 = arith.constant 16 : i32
    %31 = vector.broadcast %c16_i32 : i32 to vector<16x32xi32>
    %32 = arith.addi %30, %31 : vector<16x32xi32>
    %33 = tpu.iota {dimensions = array<i32: 1>} : vector<16x32xi32>
    %34 = arith.cmpi eq, %32, %33 : vector<16x32xi32>
    %cst_15 = arith.constant 1.000000e+00 : f32
    %cst_16 = arith.constant 0.000000e+00 : f32
    %35 = vector.broadcast %cst_15 : f32 to vector<16x32xf32>
    %36 = vector.broadcast %cst_16 : f32 to vector<16x32xf32>
    %37 = arith.select %34, %35, %36 : vector<16x32xi1>, vector<16x32xf32>
    %38 = arith.addf %29, %37 : vector<16x32xf32>
    %c16_17 = arith.constant 16 : index
    %c0_18 = arith.constant 0 : index
    %39 = vector.load %arg9[%c16_17, %c0_18] : memref<32x32xf32, #tpu.memory_space<vmem>>, vector<16x32xf32>
    tpu.vector_store %arg9[%c16_17, %c0_18], %38 {strides = array<i32>} : memref<32x32xf32, #tpu.memory_space<vmem>>, vector<16x32xf32>,
    %c0_19 = arith.constant 0 : index
    %c0_20 = arith.constant 0 : index
    %40 = vector.load %arg4[%c0_19, %c0_20] : memref<4x32xf32, #tpu.memory_space<vmem>>, vector<4x32xf32>
    %41 = vector.broadcast %0 : f32 to vector<4x32xf32>
    %42 = arith.mulf %40, %41 : vector<4x32xf32>
    %c0_21 = arith.constant 0 : index
    %c0_22 = arith.constant 0 : index
    %43 = vector.load %arg5[%c0_21, %c0_22] : memref<4x32xf32, #tpu.memory_space<vmem>>, vector<4x32xf32>
    %44 = vector.broadcast %1 : f32 to vector<4x32xf32>
    %45 = arith.mulf %43, %44 : vector<4x32xf32>
    %46 = arith.addf %42, %45 : vector<4x32xf32>
    %c0_23 = arith.constant 0 : index
    %c0_24 = arith.constant 0 : index
    %47 = vector.load %arg6[%c0_23, %c0_24] : memref<4x32xf32, #tpu.memory_space<vmem>>, vector<4x32xf32>
    %48 = arith.mulf %46, %47 : vector<4x32xf32>
    %cst_25 = arith.constant dense<0.000000e+00> : vector<32xf32>
    %49 = vector.multi_reduction <add>, %48, %cst_25 [0] : vector<4x32xf32> to vector<32xf32>
    %50 = vector.shape_cast %49 : vector<32xf32> to vector<1x32xf32>
    %c0_26 = arith.constant 0 : index
    %c0_27 = arith.constant 0 : index
    %51 = vector.load %arg7[%c0_26, %c0_27] : memref<1x32xf32, #tpu.memory_space<vmem>>, vector<1x32xf32>
    %52 = vector.broadcast %0 : f32 to vector<1x32xf32>
    %53 = arith.mulf %51, %52 : vector<1x32xf32>
    %54 = arith.addf %50, %53 : vector<1x32xf32>
    %c0_28 = arith.constant 0 : index
    %c0_29 = arith.constant 0 : index
    %55 = vector.load %arg8[%c0_28, %c0_29] : memref<1x32xf32, #tpu.memory_space<vmem>>, vector<1x32xf32>
    %56 = vector.broadcast %1 : f32 to vector<1x32xf32>
    %57 = arith.mulf %55, %56 : vector<1x32xf32>
    %58 = arith.addf %54, %57 : vector<1x32xf32>
    %c0_30 = arith.constant 0 : index
    %c0_31 = arith.constant 0 : index
    %59 = vector.load %arg10[%c0_30, %c0_31] : memref<1x32xf32, #tpu.memory_space<vmem>>, vector<1x32xf32>
    tpu.vector_store %arg10[%c0_30, %c0_31], %58 {strides = array<i32>} : memref<1x32xf32, #tpu.memory_space<vmem>>, vector<1x32xf32>,
    return
  }
}

</mosaic_0001>

<bundles_post_ra>
// kernel: tpu_custom_call.1
= control target key start
LH: loop header
LB: loop body
LE: loop exit
PB: predicated region body
PF: predicated region fallthrough
CT: control target
= control target key end

     0   :  { %16 = vsyncpa [#allocation4], 0  ;;  %s547_s0 = inlined_call_operand.vmem [shape: f32[2], index: 0, kind: input, shape index: {}]   ;;  %s548_s1 = inlined_call_operand.vmem [shape: f32[8,32], index: 1, kind: input, shape index: {}]   ;;  %s549_s2 = inlined_call_operand.vmem [shape: f32[32,4], index: 2, kind: input, shape index: {}]   ;;  %s550_s3 = inlined_call_operand.vmem [shape: f32[32,4], index: 3, kind: input, shape index: {}]   ;;  %s551_s4 = inlined_call_operand.vmem [shape: f32[4,32], index: 4, kind: input, shape index: {}]   ;;  %s552_s5 = inlined_call_operand.vmem [shape: f32[4,32], index: 5, kind: input, shape index: {}]   ;;  %s553_s6 = inlined_call_operand.vmem [shape: f32[4,32], index: 6, kind: input, shape index: {}]   ;;  %s554_s7 = inlined_call_operand.vmem [shape: f32[1,32], index: 7, kind: input, shape index: {}]   ;;  %s555_s8 = inlined_call_operand.vmem [shape: f32[1,32], index: 8, kind: input, shape index: {}]   ;;  %s556_s9 = inlined_call_operand.hbm [shape: f32[32,32], index: 9, kind: output, shape index: {0}]   ;;  %s557_s10 = inlined_call_operand.hbm [shape: f32[1,32], index: 10, kind: output, shape index: {1}]  }
   0x1   :  { %17 = vsyncpa [#allocation3], 0 }
   0x2   :  { %18 = vsyncpa [#allocation7], 0  ;;  %s25_s15 = sshll.u32 %s547_s0, 4  ;;  %s26_s15 = int_to_ptr.vmem [resolvable:$true] %s25_s15 }
   0x3   :  { %s348_s16 = scalar_lea.vmem %s26_s15, 16  ;;  %p353_p1 = scmp.lt.s32.totalorder %s26_s15, %s26_s15 }
   0x4   :  { %p349_p0 = scmp.ne.s32.totalorder %s26_s15, %s348_s16  ;;  %p354_p2 = scmp.lt.s32.totalorder %s348_s16, %s348_s16 }
   0x6   :  { %p355_p3 = por %p354_p2, %p353_p1 }
   0x8   :  { %p356_p4 = pnand %p355_p3, %p349_p0 }
   0xa   :  { %359 = shalt.err (!%p356_p4)
}
   0xb   :  { %s410_s17 = smov [#allocation2]  }
   0xc   :  { %28 = dma.vmem_to_smem %s26_s15, 16, %s410_s17, [#allocation4]  }
   0xd   :  { %404 = dma.done.wait [#allocation4], 16  }
   0xe   :  { %405 = vsyncadd [#allocation4], 4294967280 }
   0xf   :  { %48 = sfence }
  0x10   :  { %v63_v0 = vld [vmem:[%s548_s1] sm:$0xf]  ;;  %vm80_vm0 = vcmask 1043456   ;;  %v172_v1 = vld [vmem:[%s548_s1 + $0x4] sm:$0xf]  ;;  %s49_s21 = sld [smem:[#allocation2]] }
  0x11   :  { %332 = vmatprep.subr.msk.mxu0 %vm80_vm0, %v63_v0  ;;  %337 = vmatprep.subr.msk.mxu1 %vm80_vm0, %v172_v1  ;;  %s319_s22 = sld [smem:[#allocation2 + $0x1]]  ;;  %v51_v2 = vld [vmem:[%s549_s2] sm:$0xff]  ;;  %v162_v4 = vld [vmem:[%s549_s2 + $0x10] sm:$0xff]  ;;  %v52_v6 = vld [vmem:[%s549_s2 + $0x8] sm:$0xff]  ;;  %vm73_vm1 = vcmask 31744   ;;  %vm272_vm2 = vcmask 257024  }
  0x12   :  { %333 = vmatpush3.msk.msra.mxu0 %vm80_vm0, %v63_v0  ;;  %338 = vmatpush3.msk.msra.mxu1 %vm80_vm0, %v172_v1  ;;  %v56_v3 = vld [vmem:[%s550_s3] sm:$0xff]  ;;  %v166_v5 = vld [vmem:[%s550_s3 + $0x10] sm:$0xff]  ;;  %v57_v7 = vld [vmem:[%s550_s3 + $0x8] sm:$0xff]  ;;  %vm286_vm3 = vcmask 253952  }
  0x13   :  { %v163_v8 = vld [vmem:[%s549_s2 + $0x18] sm:$0xff]  ;;  %v265_v24 = vld [vmem:[%s551_s4] sm:$0xf] }
  0x14   :  { %v167_v9 = vld [vmem:[%s550_s3 + $0x18] sm:$0xff]  ;;  %v267_v25 = vld [vmem:[%s552_s5] sm:$0xf] }
  0x15   :  { %v270_v29 = vld [vmem:[%s553_s6] sm:$0xf]  ;;  %s411_s6 = smov [#allocation6]  }
  0x16   :  { %v53_v10 = vstv %s49_s21  ;;  %v280_v37 = vld [vmem:[%s554_s7] sm:$0x1]  ;;  %s306_s23 = sshll.u32 %s411_s6, 4  ;;  %s307_s23 = int_to_ptr.vmem [resolvable:$true] %s306_s23 }
  0x17   :  { %v58_v11 = vstv %s319_s22  ;;  %v54_v12 = vmul.f32 %v53_v10, %v51_v2  ;;  %v164_v14 = vmul.f32 %v162_v4, %v53_v10  ;;  %v55_v16 = vmul.f32 %v53_v10, %v52_v6  ;;  %v283_v40 = vld [vmem:[%s555_s8] sm:$0x1]  ;;  %s360_s24 = scalar_lea.vmem %s307_s23, 16  ;;  %s364_s25 = scalar_lea.vmem %s307_s23, 32 }
  0x18   :  { %v59_v13 = vmul.f32 %v58_v11, %v56_v3  ;;  %v168_v15 = vmul.f32 %v166_v5, %v58_v11  ;;  %v60_v17 = vmul.f32 %v58_v11, %v57_v7  ;;  %v165_v18 = vmul.f32 %v163_v8, %v53_v10  ;;  %p361_p5 = scmp.ne.s32.totalorder %s307_s23, %s360_s24  ;;  %p365_p6 = scmp.lt.s32.totalorder %s307_s23, %s307_s23 }
  0x19   :  { %v169_v19 = vmul.f32 %v167_v9, %v58_v11  ;;  %v266_v26 = vmul.f32 %v265_v24, %v53_v10  ;;  %v268_v27 = vmul.f32 %v267_v25, %v58_v11  ;;  %v281_v39 = vmul.f32 %v280_v37, %v53_v10  ;;  %p366_p7 = scmp.lt.s32.totalorder %s364_s25, %s360_s24 }
  0x1a   :  { %v61_v20 = vadd.f32 %v59_v13, %v54_v12  ;;  %v170_v21 = vadd.f32 %v168_v15, %v164_v14  ;;  %v62_v22 = vadd.f32 %v60_v17, %v55_v16  ;;  %v284_v42 = vmul.f32 %v283_v40, %v58_v11 }
  0x1b   :  { %v171_v23 = vadd.f32 %v169_v19, %v165_v18  ;;  %v269_v28 = vadd.f32 %v268_v27, %v266_v26  ;;  %p367_p8 = por %p366_p7, %p365_p6 }
  0x1c   :  { %334 = vmatprep.mubr.msk.f32.mxu0 %vm73_vm1, %v61_v20  ;;  %339 = vmatprep.mubr.msk.f32.mxu1 %vm73_vm1, %v170_v21 }
  0x1d   :  { %335 = vmatmul.mubr.msk.f32.vlgmr.msra.gmra.mrb[0].mxu0 %vm73_vm1, %v62_v22  ;;  %340 = vmatmul.mubr.msk.f32.vlgmr.msra.gmra.mrb[0].mxu1 %vm73_vm1, %v171_v23  ;;  %v271_v30 = vmul.f32 %v270_v29, %v269_v28  ;;  %p368_p9 = pnand %p367_p8, %p361_p5 }
  0x1f   :  { %v273_v31 = vsel %vm272_vm2, %v271_v30, 0.0 }
  0x20   :  { %v274_v32 = vrot.slane %v273_v31, 4 }
  0x22   :  { %v275_v33 = vadd.f32 %v274_v32, %v273_v31 }
  0x24   :  { %v276_v34 = vrot.slane %v275_v33, 2 }
  0x26   :  { %v277_v35 = vadd.f32 %v276_v34, %v275_v33 }
  0x28   :  { %v278_v36 = vrot.slane %v277_v35, 1 }
  0x2a   :  { %v279_v38 = vadd.f32 %v278_v36, %v277_v35 }
  0x2c   :  { %v282_v41 = vadd.f32 %v281_v39, %v279_v38 }
  0x2e   :  { %v285_v43 = vadd.f32 %v284_v42, %v282_v41 }
  0x30   :  { %287 = vst.msk [vmem:[#allocation6] sm:$0x1] %vm286_vm3, %v285_v43 }
  0x31   :  { %371 = shalt.err (!%p368_p9)
}
  0x32   :  { %s372_s8 = scalar_lea.hbm %s557_s10, 16 }
  0x33   :  { %p373_p10 = scmp.ne.s32.totalorder %s557_s10, %s372_s8  ;;  %p376_p11 = scmp.lt.u32.totalorder %s372_s8, %s557_s10 }
  0x35   :  { %p378_p12 = pnand %p376_p11, %p373_p10 }
  0x37   :  { %381 = shalt.err (!%p378_p12)
}
  0x38   :  { %309 = dma.vmem_to_hbm [thread:$0]  %s307_s23, 16, %s557_s10, [#allocation7]   ;;  %v64_v44 = vlaneseq  ;;  %v412_v50 = vmov 0.0   ;;  %vm159_vm8 = vcmask 261120  }
  0x39   :  { %s413_s12 = smov [#allocation5]  }
  0x3a   :  { %v65_v45 = vshrl.u32 %v64_v44, 7  ;;  %v68_v47 = vand.u32 127, %v64_v44  ;;  %s293_s13 = sshll.u32 %s413_s12, 4  ;;  %s294_s13 = int_to_ptr.vmem [resolvable:$true] %s293_s13 }
  0x3b   :  { %s382_s10 = scalar_lea.vmem %s294_s13, 512  ;;  %p387_p0 = scmp.lt.s32.totalorder %s294_s13, %s294_s13 }
  0x3c   :  { %v66_v46 = vadd.s32 8, %v65_v45  ;;  %v173_v49 = vadd.s32 16, %v65_v45  ;;  %vm69_vm6 = vcmp.eq.s32.totalorder %v65_v45, %v68_v47  ;;  %p383_p13 = scmp.ne.s32.totalorder %s294_s13, %s382_s10  ;;  %p388_p1 = scmp.lt.s32.totalorder %s382_s10, %s382_s10 }
  0x3d   :  { %v71_v53 = vsel %vm69_vm6, 1.0, %v412_v50 }
  0x3e   :  { %v174_v48 = vadd.s32 16, %v66_v46  ;;  %vm70_vm4 = vcmp.eq.s32.totalorder %v66_v46, %v68_v47  ;;  %vm175_vm7 = vcmp.eq.s32.totalorder %v173_v49, %v68_v47  ;;  %p389_p2 = por %p388_p1, %p387_p0 }
  0x3f   :  { %v72_v51 = vsel %vm70_vm4, 1.0, %v412_v50  ;;  %v177_v54 = vsel %vm175_vm7, 1.0, %v412_v50 }
  0x40   :  { %vm176_vm5 = vcmp.eq.s32.totalorder %v174_v48, %v68_v47  ;;  %p390_p3 = pnand %p389_p2, %p383_p13 }
  0x41   :  { %v178_v52 = vsel %vm176_vm5, 1.0, %v412_v50 }
  0xf0   :  { %v336_v55 = vpop.f32.mrb[0].mxu0  ;;  %v341_v56 = vpop.f32.mrb[0].mxu1 }
  0xf1   :  { %v156_v57 = vadd.f32 %v336_v55, %v72_v51  ;;  %v260_v58 = vadd.f32 %v341_v56, %v178_v52  ;;  %v150_v59 = vpop.f32.mrb[1].mxu0  ;;  %v254_v60 = vpop.f32.mrb[1].mxu1 }
  0xf2   :  { %v151_v61 = vadd.f32 %v150_v59, %v71_v53  ;;  %v255_v62 = vadd.f32 %v254_v60, %v177_v54 }
  0xf3   :  { %161 = vst.msk [vmem:[#allocation5 + $0x8] sm:$0xff] %vm159_vm8, %v156_v57  ;;  %264 = vst.msk [vmem:[#allocation5 + $0x18] sm:$0xff] %vm159_vm8, %v260_v58 }
  0xf4   :  { %160 = vst.msk [vmem:[#allocation5] sm:$0xff] %vm159_vm8, %v151_v61  ;;  %263 = vst.msk [vmem:[#allocation5 + $0x10] sm:$0xff] %vm159_vm8, %v255_v62 }
  0xf5   :  { %393 = shalt.err (!%p390_p3)
}
  0xf6   :  { %s394_s16 = scalar_lea.hbm %s556_s9, 512 }
  0xf7   :  { %p395_p4 = scmp.ne.s32.totalorder %s556_s9, %s394_s16  ;;  %p398_p5 = scmp.lt.u32.totalorder %s394_s16, %s556_s9 }
  0xf9   :  { %p400_p6 = pnand %p398_p5, %p395_p4 }
  0xfb   :  { %403 = shalt.err (!%p400_p6)
}
  0xfc   :  { %s414_s19 = smov 128   ;;  %s415_s20 = smov 8  }
  0xfd   :  { %299 = dma.vmem_to_hbm [thread:$0]  %s294_s13, 512, %s556_s9, [#allocation3], %s414_s19, %s414_s19, %s415_s20  }
  0xfe   :  { %406 = dma.done.wait [#allocation3], 512  }
  0xff   :  { %407 = vsyncadd [#allocation3], 4294966784 }
 0x100   :  { %408 = dma.done.wait [#allocation7], 16  }
 0x101   :  { %409 = vsyncadd [#allocation7], 4294967280 }
 0x102   :  { %316 = vsyncpa [#allocation3], 1 }
 0x103   :  { %317 = vsyncpa [#allocation7], 1 }
 0x104   :  { %318 = vsyncpa [#allocation4], 1 }

</bundles_post_ra>
